<compile_context>
chip_gen: v7x
topology: tpu7x:2x2x1
jax: 0.10.0
libtpu: 0.0.40
codegen_flags: <defaults>
</compile_context>

<pallas_src>
import functools
import math

import jax
import jax.numpy as jnp
from jax import lax
from jax.experimental import pallas as pl
from jax.experimental.pallas import tpu as pltpu


def _lstm_agg_kernel(x_ref, wih_ref, whh_ref, b_ref, out_ref,
                     gx_ref, h_ref, c_ref, *,
                     seq_len, chunk_t, batch, feat):
    """One grid step = one chunk of `chunk_t` timesteps.

    x_ref   : (chunk_t*batch, feat)   time-major rows (row = t*batch + b)
    wih_ref : (feat, 4*feat)          W_ih^T
    whh_ref : (feat, 4*feat)          W_hh^T
    b_ref   : (1, 4*feat)             b_ih + b_hh
    out_ref : (batch, feat)           h_T (constant-index -> VMEM resident)
    gx_ref  : (chunk_t*batch, 4*feat) scratch: precomputed input projection
    h_ref, c_ref : (batch, feat)      scratch: recurrent state across chunks
    """
    c_idx = pl.program_id(0)
    B, F = batch, feat

    @pl.when(c_idx == 0)
    def _():
        h_ref[...] = jnp.zeros_like(h_ref)
        c_ref[...] = jnp.zeros_like(c_ref)

    # ---- Phase 1 (off the serial critical path): one big MXU matmul for the
    # whole chunk's input projection, plus the pre-summed bias.
    gx_ref[...] = (
        jnp.dot(x_ref[...], wih_ref[...], preferred_element_type=jnp.float32)
        + b_ref[...]
    )

    whh = whh_ref[...]                       # hoisted: constant across the loop

    # Valid timesteps in this chunk (last chunk may be ragged).
    rem = seq_len % chunk_t
    if rem == 0:
        steps = chunk_t                      # static trip count
    else:
        steps = jnp.where(c_idx == pl.num_programs(0) - 1, rem, chunk_t)

    def step(t, carry):
        h, c = carry
        row = pl.multiple_of(t * B, B)
        # Single small serial matmul per step: h_prev @ W_hh^T.
        gates = gx_ref[pl.ds(row, B), :] + jnp.dot(
            h.astype(whh.dtype), whh, preferred_element_type=jnp.float32)
        # PyTorch gate order: i, f, g, o.
        i_g = jax.nn.sigmoid(gates[:, 0 * F:1 * F])
        f_g = jax.nn.sigmoid(gates[:, 1 * F:2 * F])
        g_g = jnp.tanh(gates[:, 2 * F:3 * F])
        o_g = jax.nn.sigmoid(gates[:, 3 * F:4 * F])
        c = f_g * c + i_g * g_g
        h = o_g * jnp.tanh(c)
        return (h, c)

    carry0 = (h_ref[...], c_ref[...])
    if isinstance(steps, int) and steps <= 32:
        h_new, c_new = lax.fori_loop(0, steps, step, carry0, unroll=True)
    else:
        h_new, c_new = lax.fori_loop(0, steps, step, carry0)

    h_ref[...] = h_new
    c_ref[...] = c_new
    # Constant-index output block: stays in VMEM, one HBM writeback at grid end.
    out_ref[...] = h_new.astype(out_ref.dtype)


def lstm_aggregation(x, w_ih, w_hh, b_ih, b_hh, *,
                     chunk_t=None, compute_dtype=jnp.float32):
    """LSTMAggregation.forward.

    x            : (B, T, F) float32
    w_ih, w_hh   : (4F, F)   PyTorch layout, gate order (i, f, g, o)
    b_ih, b_hh   : (4F,)
    compute_dtype: jnp.float32 (default, matches PyTorch) or jnp.bfloat16 to hit the
                   bf16-native MXU on v6e/v7x (accumulation and h/c state stay f32).
    Returns h_T  : (B, F)
    """
    B, T, F = x.shape
    assert w_ih.shape == (4 * F, F) and w_hh.shape == (4 * F, F)
    assert b_ih.shape == (4 * F,) and b_hh.shape == (4 * F,)

    if chunk_t is None:
        chunk_t = min(T, 128)
    num_chunks = (T + chunk_t - 1) // chunk_t
    t_pad = num_chunks * chunk_t

    # Time-major 2-D view of x: row = t*B + b, so chunk c owns rows
    # [c*chunk_t*B, (c+1)*chunk_t*B).  One cheap XLA copy; lets the kernel do the
    # chunk projection as a single lane/sublane-aligned 2-D matmul and fetch the
    # per-step gate rows with a dynamic sublane slice.
    x_tm = jnp.transpose(x, (1, 0, 2)).reshape(T * B, F).astype(compute_dtype)
    if t_pad != T:
        x_tm = jnp.pad(x_tm, ((0, (t_pad - T) * B), (0, 0)))

    wih_t = jnp.transpose(w_ih).astype(compute_dtype)        # (F, 4F)
    whh_t = jnp.transpose(w_hh).astype(compute_dtype)        # (F, 4F)
    bias = (b_ih + b_hh).reshape(1, 4 * F).astype(jnp.float32)

    kernel = functools.partial(
        _lstm_agg_kernel, seq_len=T, chunk_t=chunk_t, batch=B, feat=F)

    grid_spec = pltpu.PrefetchScalarGridSpec(
        num_scalar_prefetch=0,
        grid=(num_chunks,),
        in_specs=[
            pl.BlockSpec((chunk_t * B, F), lambda c: (c, 0)),   # x chunk (time-major)
            pl.BlockSpec((F, 4 * F), lambda c: (0, 0)),         # W_ih^T (constant)
            pl.BlockSpec((F, 4 * F), lambda c: (0, 0)),         # W_hh^T (constant)
            pl.BlockSpec((1, 4 * F), lambda c: (0, 0)),         # bias   (constant)
        ],
        out_specs=pl.BlockSpec((B, F), lambda c: (0, 0)),
        scratch_shapes=[
            pltpu.VMEM((chunk_t * B, 4 * F), jnp.float32),      # gates_x for the chunk
            pltpu.VMEM((B, F), jnp.float32),                    # h state (across chunks)
            pltpu.VMEM((B, F), jnp.float32),                    # c state (across chunks)
        ],
    )

    # NOTE(v7x): constant-index weight blocks are only DMA'd once; at large F use
    # compute_dtype=bf16 / smaller chunk_t to stay inside 64 MiB VMEM.  For large B
    # a leading "parallel" batch grid axis would put both v7x TensorCores to work on
    # independent batch slices of the recurrence.
    return pl.pallas_call(
        kernel,
        out_shape=jax.ShapeDtypeStruct((B, F), x.dtype),
        grid_spec=grid_spec,
        compiler_params=pltpu.CompilerParams(
            dimension_semantics=("arbitrary",),   # recurrence over time chunks
        ),
    )(x_tm, wih_t, whh_t, bias)


def lstm_reference(x, w_ih, w_hh, b_ih, b_hh):
    """Pure-JAX reference matching torch.nn.LSTM (batch_first, 1 layer)."""
    B, T, F = x.shape
    wih_t = jnp.transpose(w_ih)
    whh_t = jnp.transpose(w_hh)
    bias = b_ih + b_hh

    def step(carry, x_t):
        h, c = carry
        gates = x_t @ wih_t + h @ whh_t + bias
        i = jax.nn.sigmoid(gates[:, 0 * F:1 * F])
        f = jax.nn.sigmoid(gates[:, 1 * F:2 * F])
        g = jnp.tanh(gates[:, 2 * F:3 * F])
        o = jax.nn.sigmoid(gates[:, 3 * F:4 * F])
        c = f * c + i * g
        h = o * jnp.tanh(c)
        return (h, c), None

    h0 = jnp.zeros((B, F), jnp.float32)
    c0 = jnp.zeros((B, F), jnp.float32)
    (h_last, _), _ = lax.scan(step, (h0, c0), jnp.transpose(x, (1, 0, 2)))
    return h_last


if __name__ == "__main__":
    B, T, F = 2, 8, 32   # feature_size = 32

    key = jax.random.PRNGKey(0)
    kx, k1, k2, k3, k4 = jax.random.split(key, 5)

    x = jax.random.normal(kx, (B, T, F), dtype=jnp.float32)

    # Deterministic init matching nn.LSTM default: U(-1/sqrt(H), 1/sqrt(H))
    stdv = 1.0 / math.sqrt(F)
    w_ih = jax.random.uniform(k1, (4 * F, F), minval=-stdv, maxval=stdv, dtype=jnp.float32)
    w_hh = jax.random.uniform(k2, (4 * F, F), minval=-stdv, maxval=stdv, dtype=jnp.float32)
    b_ih = jax.random.uniform(k3, (4 * F,), minval=-stdv, maxval=stdv, dtype=jnp.float32)
    b_hh = jax.random.uniform(k4, (4 * F,), minval=-stdv, maxval=stdv, dtype=jnp.float32)

    out = lstm_aggregation(x, w_ih, w_hh, b_ih, b_hh)
    out = jax.block_until_ready(out)

    ref = lstm_reference(x, w_ih, w_hh, b_ih, b_hh)
    assert out.shape == (B, F)
    assert jnp.allclose(out, ref, atol=1e-5, rtol=1e-5), "mismatch vs reference"

    print("KERNEL_OK")
</pallas_src>

<mosaic_0001>
module attributes {stable_mosaic.version = 11 : i64} {
  func.func @_lstm_agg_kernel(%arg0: i32, %arg1: memref<16x32xf32, #tpu.memory_space<vmem>>, %arg2: memref<32x128xf32, #tpu.memory_space<vmem>>, %arg3: memref<32x128xf32, #tpu.memory_space<vmem>>, %arg4: memref<1x128xf32, #tpu.memory_space<vmem>>, %arg5: memref<2x32xf32, #tpu.memory_space<vmem>>, %arg6: memref<16x128xf32, #tpu.memory_space<vmem>>, %arg7: memref<2x32xf32, #tpu.memory_space<vmem>>, %arg8: memref<2x32xf32, #tpu.memory_space<vmem>>) attributes {dimension_semantics = [#tpu.dimension_semantics<arbitrary>], iteration_bounds = array<i64: 1>, scalar_prefetch = 0 : i64, scratch_operands = 3 : i64, tpu.core_type = #tpu.core_type<tc>, window_params = [{transform_indices = @transform_0, window_bounds = array<i64: 16, 32>}, {pipeline_mode = #tpu.pipeline_mode<synchronous>, transform_indices = @transform_1, window_bounds = array<i64: 32, 128>}, {pipeline_mode = #tpu.pipeline_mode<synchronous>, transform_indices = @transform_2, window_bounds = array<i64: 32, 128>}, {pipeline_mode = #tpu.pipeline_mode<synchronous>, transform_indices = @transform_3, window_bounds = array<i64: 1, 128>}, {pipeline_mode = #tpu.pipeline_mode<synchronous>, transform_indices = @transform_4, window_bounds = array<i64: 2, 32>}]} {
    %c0_i32 = arith.constant 0 : i32
    %0 = arith.cmpi eq, %arg0, %c0_i32 : i32
    %1 = arith.extui %0 : i1 to i32
    %c0_i32_0 = arith.constant 0 : i32
    %2 = arith.cmpi ne, %1, %c0_i32_0 : i32
    scf.if %2 {
      %cst_69 = arith.constant 0.000000e+00 : f32
      %264 = vector.broadcast %cst_69 : f32 to vector<2x32xf32>
      %c0_70 = arith.constant 0 : index
      %c0_71 = arith.constant 0 : index
      %265 = vector.load %arg7[%c0_70, %c0_71] : memref<2x32xf32, #tpu.memory_space<vmem>>, vector<2x32xf32>
      tpu.vector_store %arg7[%c0_70, %c0_71], %264 {strides = array<i32>} : memref<2x32xf32, #tpu.memory_space<vmem>>, vector<2x32xf32>,
      %cst_72 = arith.constant 0.000000e+00 : f32
      %266 = vector.broadcast %cst_72 : f32 to vector<2x32xf32>
      %c0_73 = arith.constant 0 : index
      %c0_74 = arith.constant 0 : index
      %267 = vector.load %arg8[%c0_73, %c0_74] : memref<2x32xf32, #tpu.memory_space<vmem>>, vector<2x32xf32>
      tpu.vector_store %arg8[%c0_73, %c0_74], %266 {strides = array<i32>} : memref<2x32xf32, #tpu.memory_space<vmem>>, vector<2x32xf32>,
    } else {
    }
    %c0 = arith.constant 0 : index
    %c0_1 = arith.constant 0 : index
    %3 = vector.load %arg1[%c0, %c0_1] : memref<16x32xf32, #tpu.memory_space<vmem>>, vector<16x32xf32>
    %c0_2 = arith.constant 0 : index
    %c0_3 = arith.constant 0 : index
    %4 = vector.load %arg2[%c0_2, %c0_3] : memref<32x128xf32, #tpu.memory_space<vmem>>, vector<32x128xf32>
    %cst = arith.constant dense<0.000000e+00> : vector<16x128xf32>
    %5 = tpu.matmul %3, %4, %cst {dimension_numbers = #tpu.dot_dimension_numbers<[1], [0], [0], [1], [0, 0, 1, 1], [], []>} : vector<16x32xf32>, vector<32x128xf32>, vector<16x128xf32> -> vector<16x128xf32>
    %c0_4 = arith.constant 0 : index
    %c0_5 = arith.constant 0 : index
    %6 = vector.load %arg4[%c0_4, %c0_5] : memref<1x128xf32, #tpu.memory_space<vmem>>, vector<1x128xf32>
    %7 = vector.broadcast %6 : vector<1x128xf32> to vector<16x128xf32>
    %8 = arith.addf %5, %7 : vector<16x128xf32>
    %c0_6 = arith.constant 0 : index
    %c0_7 = arith.constant 0 : index
    %9 = vector.load %arg6[%c0_6, %c0_7] : memref<16x128xf32, #tpu.memory_space<vmem>>, vector<16x128xf32>
    tpu.vector_store %arg6[%c0_6, %c0_7], %8 {strides = array<i32>} : memref<16x128xf32, #tpu.memory_space<vmem>>, vector<16x128xf32>,
    %c0_8 = arith.constant 0 : index
    %c0_9 = arith.constant 0 : index
    %10 = vector.load %arg3[%c0_8, %c0_9] : memref<32x128xf32, #tpu.memory_space<vmem>>, vector<32x128xf32>
    %c0_10 = arith.constant 0 : index
    %c0_11 = arith.constant 0 : index
    %11 = vector.load %arg7[%c0_10, %c0_11] : memref<2x32xf32, #tpu.memory_space<vmem>>, vector<2x32xf32>
    %c0_12 = arith.constant 0 : index
    %c0_13 = arith.constant 0 : index
    %12 = vector.load %arg8[%c0_12, %c0_13] : memref<2x32xf32, #tpu.memory_space<vmem>>, vector<2x32xf32>
    %c0_i32_14 = arith.constant 0 : i32
    %c2_i32 = arith.constant 2 : i32
    %13 = arith.muli %c0_i32_14, %c2_i32 : i32
    %14 = tpu.assume_multiple %13, 2 : i32
    %15 = arith.index_cast %14 : i32 to index
    %c0_15 = arith.constant 0 : index
    %16 = vector.load %arg6[%15, %c0_15] : memref<16x128xf32, #tpu.memory_space<vmem>>, vector<2x128xf32>
    %cst_16 = arith.constant dense<0.000000e+00> : vector<2x128xf32>
    %17 = tpu.matmul %11, %10, %cst_16 {dimension_numbers = #tpu.dot_dimension_numbers<[1], [0], [0], [1], [0, 0, 1, 1], [], []>} : vector<2x32xf32>, vector<32x128xf32>, vector<2x128xf32> -> vector<2x128xf32>
    %18 = arith.addf %16, %17 : vector<2x128xf32>
    %19 = vector.extract_strided_slice %18 {offsets = [0, 0], sizes = [2, 32], strides = [1, 1]} : vector<2x128xf32> to vector<2x32xf32>
    %20 = arith.negf %19 : vector<2x32xf32>
    %21 = math.exp %20 : vector<2x32xf32>
    %cst_17 = arith.constant 1.000000e+00 : f32
    %22 = vector.broadcast %cst_17 : f32 to vector<2x32xf32>
    %23 = arith.addf %22, %21 : vector<2x32xf32>
    %24 = arith.divf %22, %23 : vector<2x32xf32>
    %25 = vector.extract_strided_slice %18 {offsets = [0, 32], sizes = [2, 32], strides = [1, 1]} : vector<2x128xf32> to vector<2x32xf32>
    %26 = arith.negf %25 : vector<2x32xf32>
    %27 = math.exp %26 : vector<2x32xf32>
    %cst_18 = arith.constant 1.000000e+00 : f32
    %28 = vector.broadcast %cst_18 : f32 to vector<2x32xf32>
    %29 = arith.addf %28, %27 : vector<2x32xf32>
    %30 = arith.divf %28, %29 : vector<2x32xf32>
    %31 = vector.extract_strided_slice %18 {offsets = [0, 64], sizes = [2, 32], strides = [1, 1]} : vector<2x128xf32> to vector<2x32xf32>
    %32 = math.tanh %31 : vector<2x32xf32>
    %33 = vector.extract_strided_slice %18 {offsets = [0, 96], sizes = [2, 32], strides = [1, 1]} : vector<2x128xf32> to vector<2x32xf32>
    %34 = arith.negf %33 : vector<2x32xf32>
    %35 = math.exp %34 : vector<2x32xf32>
    %cst_19 = arith.constant 1.000000e+00 : f32
    %36 = vector.broadcast %cst_19 : f32 to vector<2x32xf32>
    %37 = arith.addf %36, %35 : vector<2x32xf32>
    %38 = arith.divf %36, %37 : vector<2x32xf32>
    %39 = arith.mulf %30, %12 : vector<2x32xf32>
    %40 = arith.mulf %24, %32 : vector<2x32xf32>
    %41 = arith.addf %39, %40 : vector<2x32xf32>
    %42 = math.tanh %41 : vector<2x32xf32>
    %43 = arith.mulf %38, %42 : vector<2x32xf32>
    %c1_i32 = arith.constant 1 : i32
    %c2_i32_20 = arith.constant 2 : i32
    %44 = arith.muli %c1_i32, %c2_i32_20 : i32
    %45 = tpu.assume_multiple %44, 2 : i32
    %46 = arith.index_cast %45 : i32 to index
    %c0_21 = arith.constant 0 : index
    %47 = vector.load %arg6[%46, %c0_21] : memref<16x128xf32, #tpu.memory_space<vmem>>, vector<2x128xf32>
    %cst_22 = arith.constant dense<0.000000e+00> : vector<2x128xf32>
    %48 = tpu.matmul %43, %10, %cst_22 {dimension_numbers = #tpu.dot_dimension_numbers<[1], [0], [0], [1], [0, 0, 1, 1], [], []>} : vector<2x32xf32>, vector<32x128xf32>, vector<2x128xf32> -> vector<2x128xf32>
    %49 = arith.addf %47, %48 : vector<2x128xf32>
    %50 = vector.extract_strided_slice %49 {offsets = [0, 0], sizes = [2, 32], strides = [1, 1]} : vector<2x128xf32> to vector<2x32xf32>
    %51 = arith.negf %50 : vector<2x32xf32>
    %52 = math.exp %51 : vector<2x32xf32>
    %cst_23 = arith.constant 1.000000e+00 : f32
    %53 = vector.broadcast %cst_23 : f32 to vector<2x32xf32>
    %54 = arith.addf %53, %52 : vector<2x32xf32>
    %55 = arith.divf %53, %54 : vector<2x32xf32>
    %56 = vector.extract_strided_slice %49 {offsets = [0, 32], sizes = [2, 32], strides = [1, 1]} : vector<2x128xf32> to vector<2x32xf32>
    %57 = arith.negf %56 : vector<2x32xf32>
    %58 = math.exp %57 : vector<2x32xf32>
    %cst_24 = arith.constant 1.000000e+00 : f32
    %59 = vector.broadcast %cst_24 : f32 to vector<2x32xf32>
    %60 = arith.addf %59, %58 : vector<2x32xf32>
    %61 = arith.divf %59, %60 : vector<2x32xf32>
    %62 = vector.extract_strided_slice %49 {offsets = [0, 64], sizes = [2, 32], strides = [1, 1]} : vector<2x128xf32> to vector<2x32xf32>
    %63 = math.tanh %62 : vector<2x32xf32>
    %64 = vector.extract_strided_slice %49 {offsets = [0, 96], sizes = [2, 32], strides = [1, 1]} : vector<2x128xf32> to vector<2x32xf32>
    %65 = arith.negf %64 : vector<2x32xf32>
    %66 = math.exp %65 : vector<2x32xf32>
    %cst_25 = arith.constant 1.000000e+00 : f32
    %67 = vector.broadcast %cst_25 : f32 to vector<2x32xf32>
    %68 = arith.addf %67, %66 : vector<2x32xf32>
    %69 = arith.divf %67, %68 : vector<2x32xf32>
    %70 = arith.mulf %61, %41 : vector<2x32xf32>
    %71 = arith.mulf %55, %63 : vector<2x32xf32>
    %72 = arith.addf %70, %71 : vector<2x32xf32>
    %73 = math.tanh %72 : vector<2x32xf32>
    %74 = arith.mulf %69, %73 : vector<2x32xf32>
    %c2_i32_26 = arith.constant 2 : i32
    %c2_i32_27 = arith.constant 2 : i32
    %75 = arith.muli %c2_i32_26, %c2_i32_27 : i32
    %76 = tpu.assume_multiple %75, 2 : i32
    %77 = arith.index_cast %76 : i32 to index
    %c0_28 = arith.constant 0 : index
    %78 = vector.load %arg6[%77, %c0_28] : memref<16x128xf32, #tpu.memory_space<vmem>>, vector<2x128xf32>
    %cst_29 = arith.constant dense<0.000000e+00> : vector<2x128xf32>
    %79 = tpu.matmul %74, %10, %cst_29 {dimension_numbers = #tpu.dot_dimension_numbers<[1], [0], [0], [1], [0, 0, 1, 1], [], []>} : vector<2x32xf32>, vector<32x128xf32>, vector<2x128xf32> -> vector<2x128xf32>
    %80 = arith.addf %78, %79 : vector<2x128xf32>
    %81 = vector.extract_strided_slice %80 {offsets = [0, 0], sizes = [2, 32], strides = [1, 1]} : vector<2x128xf32> to vector<2x32xf32>
    %82 = arith.negf %81 : vector<2x32xf32>
    %83 = math.exp %82 : vector<2x32xf32>
    %cst_30 = arith.constant 1.000000e+00 : f32
    %84 = vector.broadcast %cst_30 : f32 to vector<2x32xf32>
    %85 = arith.addf %84, %83 : vector<2x32xf32>
    %86 = arith.divf %84, %85 : vector<2x32xf32>
    %87 = vector.extract_strided_slice %80 {offsets = [0, 32], sizes = [2, 32], strides = [1, 1]} : vector<2x128xf32> to vector<2x32xf32>
    %88 = arith.negf %87 : vector<2x32xf32>
    %89 = math.exp %88 : vector<2x32xf32>
    %cst_31 = arith.constant 1.000000e+00 : f32
    %90 = vector.broadcast %cst_31 : f32 to vector<2x32xf32>
    %91 = arith.addf %90, %89 : vector<2x32xf32>
    %92 = arith.divf %90, %91 : vector<2x32xf32>
    %93 = vector.extract_strided_slice %80 {offsets = [0, 64], sizes = [2, 32], strides = [1, 1]} : vector<2x128xf32> to vector<2x32xf32>
    %94 = math.tanh %93 : vector<2x32xf32>
    %95 = vector.extract_strided_slice %80 {offsets = [0, 96], sizes = [2, 32], strides = [1, 1]} : vector<2x128xf32> to vector<2x32xf32>
    %96 = arith.negf %95 : vector<2x32xf32>
    %97 = math.exp %96 : vector<2x32xf32>
    %cst_32 = arith.constant 1.000000e+00 : f32
    %98 = vector.broadcast %cst_32 : f32 to vector<2x32xf32>
    %99 = arith.addf %98, %97 : vector<2x32xf32>
    %100 = arith.divf %98, %99 : vector<2x32xf32>
    %101 = arith.mulf %92, %72 : vector<2x32xf32>
    %102 = arith.mulf %86, %94 : vector<2x32xf32>
    %103 = arith.addf %101, %102 : vector<2x32xf32>
    %104 = math.tanh %103 : vector<2x32xf32>
    %105 = arith.mulf %100, %104 : vector<2x32xf32>
    %c3_i32 = arith.constant 3 : i32
    %c2_i32_33 = arith.constant 2 : i32
    %106 = arith.muli %c3_i32, %c2_i32_33 : i32
    %107 = tpu.assume_multiple %106, 2 : i32
    %108 = arith.index_cast %107 : i32 to index
    %c0_34 = arith.constant 0 : index
    %109 = vector.load %arg6[%108, %c0_34] : memref<16x128xf32, #tpu.memory_space<vmem>>, vector<2x128xf32>
    %cst_35 = arith.constant dense<0.000000e+00> : vector<2x128xf32>
    %110 = tpu.matmul %105, %10, %cst_35 {dimension_numbers = #tpu.dot_dimension_numbers<[1], [0], [0], [1], [0, 0, 1, 1], [], []>} : vector<2x32xf32>, vector<32x128xf32>, vector<2x128xf32> -> vector<2x128xf32>
    %111 = arith.addf %109, %110 : vector<2x128xf32>
    %112 = vector.extract_strided_slice %111 {offsets = [0, 0], sizes = [2, 32], strides = [1, 1]} : vector<2x128xf32> to vector<2x32xf32>
    %113 = arith.negf %112 : vector<2x32xf32>
    %114 = math.exp %113 : vector<2x32xf32>
    %cst_36 = arith.constant 1.000000e+00 : f32
    %115 = vector.broadcast %cst_36 : f32 to vector<2x32xf32>
    %116 = arith.addf %115, %114 : vector<2x32xf32>
    %117 = arith.divf %115, %116 : vector<2x32xf32>
    %118 = vector.extract_strided_slice %111 {offsets = [0, 32], sizes = [2, 32], strides = [1, 1]} : vector<2x128xf32> to vector<2x32xf32>
    %119 = arith.negf %118 : vector<2x32xf32>
    %120 = math.exp %119 : vector<2x32xf32>
    %cst_37 = arith.constant 1.000000e+00 : f32
    %121 = vector.broadcast %cst_37 : f32 to vector<2x32xf32>
    %122 = arith.addf %121, %120 : vector<2x32xf32>
    %123 = arith.divf %121, %122 : vector<2x32xf32>
    %124 = vector.extract_strided_slice %111 {offsets = [0, 64], sizes = [2, 32], strides = [1, 1]} : vector<2x128xf32> to vector<2x32xf32>
    %125 = math.tanh %124 : vector<2x32xf32>
    %126 = vector.extract_strided_slice %111 {offsets = [0, 96], sizes = [2, 32], strides = [1, 1]} : vector<2x128xf32> to vector<2x32xf32>
    %127 = arith.negf %126 : vector<2x32xf32>
    %128 = math.exp %127 : vector<2x32xf32>
    %cst_38 = arith.constant 1.000000e+00 : f32
    %129 = vector.broadcast %cst_38 : f32 to vector<2x32xf32>
    %130 = arith.addf %129, %128 : vector<2x32xf32>
    %131 = arith.divf %129, %130 : vector<2x32xf32>
    %132 = arith.mulf %123, %103 : vector<2x32xf32>
    %133 = arith.mulf %117, %125 : vector<2x32xf32>
    %134 = arith.addf %132, %133 : vector<2x32xf32>
    %135 = math.tanh %134 : vector<2x32xf32>
    %136 = arith.mulf %131, %135 : vector<2x32xf32>
    %c4_i32 = arith.constant 4 : i32
    %c2_i32_39 = arith.constant 2 : i32
    %137 = arith.muli %c4_i32, %c2_i32_39 : i32
    %138 = tpu.assume_multiple %137, 2 : i32
    %139 = arith.index_cast %138 : i32 to index
    %c0_40 = arith.constant 0 : index
    %140 = vector.load %arg6[%139, %c0_40] : memref<16x128xf32, #tpu.memory_space<vmem>>, vector<2x128xf32>
    %cst_41 = arith.constant dense<0.000000e+00> : vector<2x128xf32>
    %141 = tpu.matmul %136, %10, %cst_41 {dimension_numbers = #tpu.dot_dimension_numbers<[1], [0], [0], [1], [0, 0, 1, 1], [], []>} : vector<2x32xf32>, vector<32x128xf32>, vector<2x128xf32> -> vector<2x128xf32>
    %142 = arith.addf %140, %141 : vector<2x128xf32>
    %143 = vector.extract_strided_slice %142 {offsets = [0, 0], sizes = [2, 32], strides = [1, 1]} : vector<2x128xf32> to vector<2x32xf32>
    %144 = arith.negf %143 : vector<2x32xf32>
    %145 = math.exp %144 : vector<2x32xf32>
    %cst_42 = arith.constant 1.000000e+00 : f32
    %146 = vector.broadcast %cst_42 : f32 to vector<2x32xf32>
    %147 = arith.addf %146, %145 : vector<2x32xf32>
    %148 = arith.divf %146, %147 : vector<2x32xf32>
    %149 = vector.extract_strided_slice %142 {offsets = [0, 32], sizes = [2, 32], strides = [1, 1]} : vector<2x128xf32> to vector<2x32xf32>
    %150 = arith.negf %149 : vector<2x32xf32>
    %151 = math.exp %150 : vector<2x32xf32>
    %cst_43 = arith.constant 1.000000e+00 : f32
    %152 = vector.broadcast %cst_43 : f32 to vector<2x32xf32>
    %153 = arith.addf %152, %151 : vector<2x32xf32>
    %154 = arith.divf %152, %153 : vector<2x32xf32>
    %155 = vector.extract_strided_slice %142 {offsets = [0, 64], sizes = [2, 32], strides = [1, 1]} : vector<2x128xf32> to vector<2x32xf32>
    %156 = math.tanh %155 : vector<2x32xf32>
    %157 = vector.extract_strided_slice %142 {offsets = [0, 96], sizes = [2, 32], strides = [1, 1]} : vector<2x128xf32> to vector<2x32xf32>
    %158 = arith.negf %157 : vector<2x32xf32>
    %159 = math.exp %158 : vector<2x32xf32>
    %cst_44 = arith.constant 1.000000e+00 : f32
    %160 = vector.broadcast %cst_44 : f32 to vector<2x32xf32>
    %161 = arith.addf %160, %159 : vector<2x32xf32>
    %162 = arith.divf %160, %161 : vector<2x32xf32>
    %163 = arith.mulf %154, %134 : vector<2x32xf32>
    %164 = arith.mulf %148, %156 : vector<2x32xf32>
    %165 = arith.addf %163, %164 : vector<2x32xf32>
    %166 = math.tanh %165 : vector<2x32xf32>
    %167 = arith.mulf %162, %166 : vector<2x32xf32>
    %c5_i32 = arith.constant 5 : i32
    %c2_i32_45 = arith.constant 2 : i32
    %168 = arith.muli %c5_i32, %c2_i32_45 : i32
    %169 = tpu.assume_multiple %168, 2 : i32
    %170 = arith.index_cast %169 : i32 to index
    %c0_46 = arith.constant 0 : index
    %171 = vector.load %arg6[%170, %c0_46] : memref<16x128xf32, #tpu.memory_space<vmem>>, vector<2x128xf32>
    %cst_47 = arith.constant dense<0.000000e+00> : vector<2x128xf32>
    %172 = tpu.matmul %167, %10, %cst_47 {dimension_numbers = #tpu.dot_dimension_numbers<[1], [0], [0], [1], [0, 0, 1, 1], [], []>} : vector<2x32xf32>, vector<32x128xf32>, vector<2x128xf32> -> vector<2x128xf32>
    %173 = arith.addf %171, %172 : vector<2x128xf32>
    %174 = vector.extract_strided_slice %173 {offsets = [0, 0], sizes = [2, 32], strides = [1, 1]} : vector<2x128xf32> to vector<2x32xf32>
    %175 = arith.negf %174 : vector<2x32xf32>
    %176 = math.exp %175 : vector<2x32xf32>
    %cst_48 = arith.constant 1.000000e+00 : f32
    %177 = vector.broadcast %cst_48 : f32 to vector<2x32xf32>
    %178 = arith.addf %177, %176 : vector<2x32xf32>
    %179 = arith.divf %177, %178 : vector<2x32xf32>
    %180 = vector.extract_strided_slice %173 {offsets = [0, 32], sizes = [2, 32], strides = [1, 1]} : vector<2x128xf32> to vector<2x32xf32>
    %181 = arith.negf %180 : vector<2x32xf32>
    %182 = math.exp %181 : vector<2x32xf32>
    %cst_49 = arith.constant 1.000000e+00 : f32
    %183 = vector.broadcast %cst_49 : f32 to vector<2x32xf32>
    %184 = arith.addf %183, %182 : vector<2x32xf32>
    %185 = arith.divf %183, %184 : vector<2x32xf32>
    %186 = vector.extract_strided_slice %173 {offsets = [0, 64], sizes = [2, 32], strides = [1, 1]} : vector<2x128xf32> to vector<2x32xf32>
    %187 = math.tanh %186 : vector<2x32xf32>
    %188 = vector.extract_strided_slice %173 {offsets = [0, 96], sizes = [2, 32], strides = [1, 1]} : vector<2x128xf32> to vector<2x32xf32>
    %189 = arith.negf %188 : vector<2x32xf32>
    %190 = math.exp %189 : vector<2x32xf32>
    %cst_50 = arith.constant 1.000000e+00 : f32
    %191 = vector.broadcast %cst_50 : f32 to vector<2x32xf32>
    %192 = arith.addf %191, %190 : vector<2x32xf32>
    %193 = arith.divf %191, %192 : vector<2x32xf32>
    %194 = arith.mulf %185, %165 : vector<2x32xf32>
    %195 = arith.mulf %179, %187 : vector<2x32xf32>
    %196 = arith.addf %194, %195 : vector<2x32xf32>
    %197 = math.tanh %196 : vector<2x32xf32>
    %198 = arith.mulf %193, %197 : vector<2x32xf32>
    %c6_i32 = arith.constant 6 : i32
    %c2_i32_51 = arith.constant 2 : i32
    %199 = arith.muli %c6_i32, %c2_i32_51 : i32
    %200 = tpu.assume_multiple %199, 2 : i32
    %201 = arith.index_cast %200 : i32 to index
    %c0_52 = arith.constant 0 : index
    %202 = vector.load %arg6[%201, %c0_52] : memref<16x128xf32, #tpu.memory_space<vmem>>, vector<2x128xf32>
    %cst_53 = arith.constant dense<0.000000e+00> : vector<2x128xf32>
    %203 = tpu.matmul %198, %10, %cst_53 {dimension_numbers = #tpu.dot_dimension_numbers<[1], [0], [0], [1], [0, 0, 1, 1], [], []>} : vector<2x32xf32>, vector<32x128xf32>, vector<2x128xf32> -> vector<2x128xf32>
    %204 = arith.addf %202, %203 : vector<2x128xf32>
    %205 = vector.extract_strided_slice %204 {offsets = [0, 0], sizes = [2, 32], strides = [1, 1]} : vector<2x128xf32> to vector<2x32xf32>
    %206 = arith.negf %205 : vector<2x32xf32>
    %207 = math.exp %206 : vector<2x32xf32>
    %cst_54 = arith.constant 1.000000e+00 : f32
    %208 = vector.broadcast %cst_54 : f32 to vector<2x32xf32>
    %209 = arith.addf %208, %207 : vector<2x32xf32>
    %210 = arith.divf %208, %209 : vector<2x32xf32>
    %211 = vector.extract_strided_slice %204 {offsets = [0, 32], sizes = [2, 32], strides = [1, 1]} : vector<2x128xf32> to vector<2x32xf32>
    %212 = arith.negf %211 : vector<2x32xf32>
    %213 = math.exp %212 : vector<2x32xf32>
    %cst_55 = arith.constant 1.000000e+00 : f32
    %214 = vector.broadcast %cst_55 : f32 to vector<2x32xf32>
    %215 = arith.addf %214, %213 : vector<2x32xf32>
    %216 = arith.divf %214, %215 : vector<2x32xf32>
    %217 = vector.extract_strided_slice %204 {offsets = [0, 64], sizes = [2, 32], strides = [1, 1]} : vector<2x128xf32> to vector<2x32xf32>
    %218 = math.tanh %217 : vector<2x32xf32>
    %219 = vector.extract_strided_slice %204 {offsets = [0, 96], sizes = [2, 32], strides = [1, 1]} : vector<2x128xf32> to vector<2x32xf32>
    %220 = arith.negf %219 : vector<2x32xf32>
    %221 = math.exp %220 : vector<2x32xf32>
    %cst_56 = arith.constant 1.000000e+00 : f32
    %222 = vector.broadcast %cst_56 : f32 to vector<2x32xf32>
    %223 = arith.addf %222, %221 : vector<2x32xf32>
    %224 = arith.divf %222, %223 : vector<2x32xf32>
    %225 = arith.mulf %216, %196 : vector<2x32xf32>
    %226 = arith.mulf %210, %218 : vector<2x32xf32>
    %227 = arith.addf %225, %226 : vector<2x32xf32>
    %228 = math.tanh %227 : vector<2x32xf32>
    %229 = arith.mulf %224, %228 : vector<2x32xf32>
    %c7_i32 = arith.constant 7 : i32
    %c2_i32_57 = arith.constant 2 : i32
    %230 = arith.muli %c7_i32, %c2_i32_57 : i32
    %231 = tpu.assume_multiple %230, 2 : i32
    %232 = arith.index_cast %231 : i32 to index
    %c0_58 = arith.constant 0 : index
    %233 = vector.load %arg6[%232, %c0_58] : memref<16x128xf32, #tpu.memory_space<vmem>>, vector<2x128xf32>
    %cst_59 = arith.constant dense<0.000000e+00> : vector<2x128xf32>
    %234 = tpu.matmul %229, %10, %cst_59 {dimension_numbers = #tpu.dot_dimension_numbers<[1], [0], [0], [1], [0, 0, 1, 1], [], []>} : vector<2x32xf32>, vector<32x128xf32>, vector<2x128xf32> -> vector<2x128xf32>
    %235 = arith.addf %233, %234 : vector<2x128xf32>
    %236 = vector.extract_strided_slice %235 {offsets = [0, 0], sizes = [2, 32], strides = [1, 1]} : vector<2x128xf32> to vector<2x32xf32>
    %237 = arith.negf %236 : vector<2x32xf32>
    %238 = math.exp %237 : vector<2x32xf32>
    %cst_60 = arith.constant 1.000000e+00 : f32
    %239 = vector.broadcast %cst_60 : f32 to vector<2x32xf32>
    %240 = arith.addf %239, %238 : vector<2x32xf32>
    %241 = arith.divf %239, %240 : vector<2x32xf32>
    %242 = vector.extract_strided_slice %235 {offsets = [0, 32], sizes = [2, 32], strides = [1, 1]} : vector<2x128xf32> to vector<2x32xf32>
    %243 = arith.negf %242 : vector<2x32xf32>
    %244 = math.exp %243 : vector<2x32xf32>
    %cst_61 = arith.constant 1.000000e+00 : f32
    %245 = vector.broadcast %cst_61 : f32 to vector<2x32xf32>
    %246 = arith.addf %245, %244 : vector<2x32xf32>
    %247 = arith.divf %245, %246 : vector<2x32xf32>
    %248 = vector.extract_strided_slice %235 {offsets = [0, 64], sizes = [2, 32], strides = [1, 1]} : vector<2x128xf32> to vector<2x32xf32>
    %249 = math.tanh %248 : vector<2x32xf32>
    %250 = vector.extract_strided_slice %235 {offsets = [0, 96], sizes = [2, 32], strides = [1, 1]} : vector<2x128xf32> to vector<2x32xf32>
    %251 = arith.negf %250 : vector<2x32xf32>
    %252 = math.exp %251 : vector<2x32xf32>
    %cst_62 = arith.constant 1.000000e+00 : f32
    %253 = vector.broadcast %cst_62 : f32 to vector<2x32xf32>
    %254 = arith.addf %253, %252 : vector<2x32xf32>
    %255 = arith.divf %253, %254 : vector<2x32xf32>
    %256 = arith.mulf %247, %227 : vector<2x32xf32>
    %257 = arith.mulf %241, %249 : vector<2x32xf32>
    %258 = arith.addf %256, %257 : vector<2x32xf32>
    %259 = math.tanh %258 : vector<2x32xf32>
    %260 = arith.mulf %255, %259 : vector<2x32xf32>
    %c8_i32 = arith.constant 8 : i32
    %c0_63 = arith.constant 0 : index
    %c0_64 = arith.constant 0 : index
    %261 = vector.load %arg7[%c0_63, %c0_64] : memref<2x32xf32, #tpu.memory_space<vmem>>, vector<2x32xf32>
    tpu.vector_store %arg7[%c0_63, %c0_64], %260 {strides = array<i32>} : memref<2x32xf32, #tpu.memory_space<vmem>>, vector<2x32xf32>,
    %c0_65 = arith.constant 0 : index
    %c0_66 = arith.constant 0 : index
    %262 = vector.load %arg8[%c0_65, %c0_66] : memref<2x32xf32, #tpu.memory_space<vmem>>, vector<2x32xf32>
    tpu.vector_store %arg8[%c0_65, %c0_66], %258 {strides = array<i32>} : memref<2x32xf32, #tpu.memory_space<vmem>>, vector<2x32xf32>,
    %c0_67 = arith.constant 0 : index
    %c0_68 = arith.constant 0 : index
    %263 = vector.load %arg5[%c0_67, %c0_68] : memref<2x32xf32, #tpu.memory_space<vmem>>, vector<2x32xf32>
    tpu.vector_store %arg5[%c0_67, %c0_68], %260 {strides = array<i32>} : memref<2x32xf32, #tpu.memory_space<vmem>>, vector<2x32xf32>,
    return
  }
  func.func @transform_0(%arg0: i32) -> (i32, i32) {
    %c0_i32 = arith.constant 0 : i32
    %c0_i32_0 = arith.constant 0 : i32
    return %arg0, %c0_i32 : i32, i32
  }
  func.func @transform_1(%arg0: i32) -> (i32, i32) {
    %c0_i32 = arith.constant 0 : i32
    %c0_i32_0 = arith.constant 0 : i32
    %c0_i32_1 = arith.constant 0 : i32
    return %c0_i32, %c0_i32_0 : i32, i32
  }
  func.func @transform_2(%arg0: i32) -> (i32, i32) {
    %c0_i32 = arith.constant 0 : i32
    %c0_i32_0 = arith.constant 0 : i32
    %c0_i32_1 = arith.constant 0 : i32
    return %c0_i32, %c0_i32_0 : i32, i32
  }
  func.func @transform_3(%arg0: i32) -> (i32, i32) {
    %c0_i32 = arith.constant 0 : i32
    %c0_i32_0 = arith.constant 0 : i32
    %c0_i32_1 = arith.constant 0 : i32
    return %c0_i32, %c0_i32_0 : i32, i32
  }
  func.func @transform_4(%arg0: i32) -> (i32, i32) {
    %c0_i32 = arith.constant 0 : i32
    %c0_i32_0 = arith.constant 0 : i32
    %c0_i32_1 = arith.constant 0 : i32
    return %c0_i32, %c0_i32_0 : i32, i32
  }
}

</mosaic_0001>

<bundles_post_ra>
// kernel: tpu_custom_call.1
= control target key start
LH: loop header
LB: loop body
LE: loop exit
PB: predicated region body
PF: predicated region fallthrough
CT: control target
= control target key end

     0   :  { %9 = vsyncpa [#allocation6], 0  ;;  %s1610_s0 = inlined_call_operand.hbm [shape: f32[16,32], index: 0, kind: input, shape index: {}]   ;;  %s1611_s1 = inlined_call_operand.hbm [shape: f32[32,128], index: 1, kind: input, shape index: {}]   ;;  %s1612_s2 = inlined_call_operand.hbm [shape: f32[32,128], index: 2, kind: input, shape index: {}]   ;;  %s1613_s3 = inlined_call_operand.vmem [shape: f32[1,128], index: 3, kind: input, shape index: {}]   ;;  %s1614_s4 = inlined_call_operand.hbm [shape: f32[2,32], index: 4, kind: output, shape index: {}]  }
   0x1   :  { %10 = vsyncpa [#allocation9], 0 }
   0x2   :  { %11 = vsyncpa [#allocation7], 0  ;;  %s1404_s15 = smov [#allocation8]   ;;  %s1405_s17 = smov [#allocation5]  }
   0x3   :  { %s29_s16 = sshll.u32 %s1404_s15, 4  ;;  %s17_s18 = sshll.u32 %s1405_s17, 4  ;;  %s30_s16 = int_to_ptr.vmem [resolvable:$true] %s29_s16  ;;  %s1441_s18 = int_to_ptr.vmem [resolvable:$true] %s17_s18 }
   0x4   :  { %s1310_s21 = scalar_lea.hbm %s1611_s1, 512 }
   0x5   :  { %p1311_p0 = scmp.ne.s32.totalorder %s1611_s1, %s1310_s21  ;;  %p1314_p1 = scmp.lt.u32.totalorder %s1310_s21, %s1611_s1 }
   0x7   :  { %p1316_p2 = pnand %p1314_p1, %p1311_p0 }
   0x9   :  { %1319 = shalt.err (!%p1316_p2)
}
   0xa   :  { %s1320_s26 = scalar_lea.vmem %s30_s16, 512  ;;  %p1325_p4 = scmp.lt.s32.totalorder %s30_s16, %s30_s16 }
   0xb   :  { %p1321_p3 = scmp.ne.s32.totalorder %s30_s16, %s1320_s26  ;;  %p1326_p5 = scmp.lt.s32.totalorder %s1320_s26, %s1320_s26 }
   0xd   :  { %p1327_p6 = por %p1326_p5, %p1325_p4 }
   0xf   :  { %p1328_p7 = pnand %p1327_p6, %p1321_p3 }
  0x11   :  { %1331 = shalt.err (!%p1328_p7)
}
  0x12   :  { %s1406_s27 = smov 128   ;;  %s1407_s28 = smov 8  }
  0x13   :  { %35 = dma.hbm_to_vmem [thread:$0]  %s1611_s1, 512, %s30_s16, [#allocation9], %s1406_s27, %s1406_s27, %s1407_s28  }
  0x14   :  { %s1332_s7 = scalar_lea.hbm %s1610_s0, 256 }
  0x15   :  { %p1333_p8 = scmp.ne.s32.totalorder %s1610_s0, %s1332_s7  ;;  %p1336_p9 = scmp.lt.u32.totalorder %s1332_s7, %s1610_s0 }
  0x17   :  { %p1338_p10 = pnand %p1336_p9, %p1333_p8 }
  0x19   :  { %1341 = shalt.err (!%p1338_p10)
}
  0x1a   :  { %s1342_s12 = scalar_lea.vmem %s1441_s18, 256  ;;  %p1347_p12 = scmp.lt.s32.totalorder %s1441_s18, %s1441_s18 }
  0x1b   :  { %p1343_p11 = scmp.ne.s32.totalorder %s1441_s18, %s1342_s12  ;;  %p1348_p13 = scmp.lt.s32.totalorder %s1342_s12, %s1342_s12 }
  0x1d   :  { %p1349_p0 = por %p1348_p13, %p1347_p12 }
  0x1f   :  { %p1350_p1 = pnand %p1349_p0, %p1343_p11 }
  0x21   :  { %1353 = shalt.err (!%p1350_p1)
}
  0x22   :  { %23 = dma.hbm_to_vmem [thread:$0]  %s1610_s0, 256, %s1441_s18, [#allocation6], %s1406_s27, %s1406_s27, %s1407_s28  }
  0x23   :  { %s1408_s14 = smov [#allocation10]   ;;  %s1354_s19 = scalar_lea.hbm %s1612_s2, 512 }
  0x24   :  { %s41_s15 = sshll.u32 %s1408_s14, 4  ;;  %p1355_p2 = scmp.ne.s32.totalorder %s1612_s2, %s1354_s19  ;;  %s42_s15 = int_to_ptr.vmem [resolvable:$true] %s41_s15 }
  0x25   :  { %p1358_p3 = scmp.lt.u32.totalorder %s1354_s19, %s1612_s2 }
  0x27   :  { %p1360_p4 = pnand %p1358_p3, %p1355_p2 }
  0x29   :  { %1363 = shalt.err (!%p1360_p4)
}
  0x2a   :  { %s1364_s24 = scalar_lea.vmem %s42_s15, 512  ;;  %p1369_p6 = scmp.lt.s32.totalorder %s42_s15, %s42_s15 }
  0x2b   :  { %p1365_p5 = scmp.ne.s32.totalorder %s42_s15, %s1364_s24  ;;  %p1370_p7 = scmp.lt.s32.totalorder %s1364_s24, %s1364_s24 }
  0x2d   :  { %p1371_p8 = por %p1370_p7, %p1369_p6 }
  0x2f   :  { %p1372_p9 = pnand %p1371_p8, %p1365_p5 }
  0x31   :  { %1375 = shalt.err (!%p1372_p9)
}
  0x32   :  { %47 = dma.hbm_to_vmem [thread:$0]  %s1612_s2, 512, %s42_s15, [#allocation9], %s1406_s27, %s1406_s27, %s1407_s28  }
  0x33   :  { %1398 = dma.done.wait [#allocation6], 256  }
  0x34   :  { %1399 = vsyncadd [#allocation6], 4294967040 }
  0x35   :  { %1400 = dma.done.wait [#allocation9], 1024  }
  0x36   :  { %1401 = vsyncadd [#allocation9], 4294966272  ;;  %v1409_v0 = vmov 0.0|0.0   ;;  %vm1410_vm0 = vmmov 0   ;;  %v1411_v1 = vmov 0.0   ;;  %vm63_vm1 = vcmask 254976  }
  0x37   :  { %1186 = vmatprep.subr.bf16.mxu1 %v1409_v0  ;;  %1098 = vmatprep.mubr.msk.f32.mxu1 %vm1410_vm0, %v1411_v1  ;;  %64 = vst.msk [vmem:[#allocation3] sm:$0x3] %vm63_vm1, %v1411_v1  ;;  %65 = vst.msk [vmem:[#allocation4] sm:$0x3] %vm63_vm1, %v1411_v1  ;;  %vm79_vm2 = vcmask 261120   ;;  %v68_v2 = vld [vmem:[#allocation8] sm:$0xff] }
  0x38   :  { %v69_v3 = vld [vmem:[#allocation8 + $0x8] sm:$0xff]  ;;  %v70_v4 = vld [vmem:[#allocation8 + $0x10] sm:$0xff]  ;;  %v71_v6 = vld [vmem:[#allocation8 + $0x18] sm:$0xff]  ;;  %s1412_s26 = smov 64   ;;  %s1413_s27 = smov 32  }
  0x39   :  { %v1178_v5 = vpack.c.bf16 %v69_v3, %v68_v2  ;;  %v66_v7 = vld [vmem:[#allocation5] sm:$0xff]  ;;  %v1182_v8 = vpack.c.bf16 %v71_v6, %v70_v4  ;;  %v163_v9 = vld [vmem:[#allocation10] sm:$0xff]  ;;  %v164_v10 = vld [vmem:[#allocation10 + $0x8] sm:$0xff]  ;;  %s1415_s28 = smov [#allocation11]  }
  0x3a   :  { %1087 = vmatprep.mubr.msk.f32.mxu0 %vm79_vm2, %v66_v7  ;;  %v165_v11 = vld [vmem:[#allocation10 + $0x10] sm:$0xff]  ;;  %v1501_v12 = vpack.c.bf16 %v164_v10, %v163_v9  ;;  %v166_v13 = vld [vmem:[#allocation10 + $0x18] sm:$0xff]  ;;  %s1004_s29 = sshll.u32 %s1415_s28, 4  ;;  %s1005_s29 = int_to_ptr.vmem [resolvable:$true] %s1004_s29 }
  0x3b   :  { %1179 = vmatprep.subr.bf16.mxu0 %v1178_v5  ;;  %v1504_v14 = vpack.c.bf16 %v166_v13, %v165_v11  ;;  %v67_v15 = vld [vmem:[#allocation5 + $0x8] sm:$0xff]  ;;  %s1376_s30 = scalar_lea.vmem %s1005_s29, 32  ;;  %p1381_p11 = scmp.lt.s32.totalorder %s1005_s29, %s1005_s29 }
  0x3c   :  { %1181 = vmatpush3.bf16.msra.mxu0 %v1178_v5  ;;  %1188 = vmatpush3.bf16.msra.mxu1 %v1501_v12  ;;  %v1014_v17 = vld [vmem:[%s1613_s3] ss:$0 sm:$0xff]  ;;  %s1414_s3 = smov 96   ;;  %p1377_p10 = scmp.ne.s32.totalorder %s1005_s29, %s1376_s30 }
  0x3d   :  { %1183 = vmatprep.subr.bf16.mxu0 %v1182_v8  ;;  %1189 = vmatprep.subr.bf16.mxu1 %v1409_v0  ;;  %p1382_p12 = scmp.lt.s32.totalorder %s1376_s30, %s1376_s30 }
  0x3e   :  { %v167_v16 = vld [vmem:[#allocation3] sm:$0x3]  ;;  %v168_v27 = vld [vmem:[#allocation4] sm:$0x3] }
  0x3f   :  { %p1383_p13 = por %p1382_p12, %p1381_p11 }
  0x40   :  { %1185 = vmatpush3.bf16.msra.mxu0 %v1182_v8  ;;  %1191 = vmatpush3.bf16.msra.mxu1 %v1504_v14 }
  0x41   :  { %1192 = vmatprep.subr.bf16.mxu0 %v1409_v0  ;;  %1198 = vmatprep.subr.bf16.mxu1 %v1409_v0  ;;  %p1384_p0 = pnand %p1383_p13, %p1377_p10 }
  0x43   :  { %1088 = vmatmul.mubr.msk.f32.vlgmr.msra.gmra.mrb[0].mxu0 %vm79_vm2, %v67_v15  ;;  %1099 = vmatmul.mubr.msk.f32.vlgmr.msra.gmra.mrb[0].mxu1 %vm79_vm2, %v167_v16 }
  0x44   :  { %1194 = vmatpush3.bf16.msra.mxu0 %v1501_v12  ;;  %1109 = vmatprep.mubr.msk.f32.mxu0 %vm1410_vm0, %v1411_v1 }
  0x45   :  { %1195 = vmatprep.subr.bf16.mxu0 %v1409_v0  ;;  %1200 = vmatpush3.bf16.msra.mxu1 %v1501_v12 }
  0x46   :  { %1120 = vmatprep.mubr.msk.f32.mxu1 %vm1410_vm0, %v1411_v1  ;;  %1201 = vmatprep.subr.bf16.mxu1 %v1409_v0 }
  0x48   :  { %1197 = vmatpush3.bf16.msra.mxu0 %v1504_v14 }
  0x49   :  { %1204 = vmatprep.subr.bf16.mxu0 %v1409_v0  ;;  %1203 = vmatpush3.bf16.msra.mxu1 %v1504_v14 }
  0x4a   :  { %1210 = vmatprep.subr.bf16.mxu1 %v1409_v0 }
 0x116   :  { %v1089_v18 = vpop.f32.mrb[0].mxu0  ;;  %v239_v21 = vpop.f32.mrb[0].mxu1 }
 0x117   :  { %v158_v19 = vadd.f32 %v1089_v18, %v1014_v17  ;;  %v152_v20 = vpop.f32.mrb[1].mxu0  ;;  %v1100_v23 = vpop.f32.mrb[1].mxu1 }
 0x118   :  { %v153_v22 = vadd.f32 %v1014_v17, %v152_v20 }
 0x119   :  { %162 = vst [vmem:[#allocation2 + $0x8] sm:$0xff] %v158_v19 }
 0x11a   :  { %161 = vst [vmem:[#allocation2] sm:$0xff] %v153_v22 }
 0x121   :  { %v169_v24 = vld [vmem:[#allocation2] sm:$0x3]  ;;  %v273_v42 = vld [vmem:[#allocation2 + $0x2] sm:$0x3]  ;;  %v375_v60 = vld [vmem:[#allocation2 + $0x4] sm:$0x3] }
 0x122   :  { %v243_v25 = vadd.f32 %v239_v21, %v169_v24  ;;  %v477_v18 = vld [vmem:[#allocation2 + $0x6] sm:$0x3] }
 0x124   :  { %1246 = vtanh.f32 %v243_v25  ;;  %v1018_v28 = vmul.f32 -1.442695, %v243_v25 }
 0x126   :  { %1248 = vpow2.f32 %v1018_v28 }
 0x12e   :  { %v1247_v26 = vpop.eup %1246 }
 0x12f   :  { %257 = vrot.lane.b32.xlu0 %v1247_v26, %s1412_s26 }
 0x130   :  { %v1249_v29 = vpop.eup %1248 }
 0x131   :  { %v247_v30 = vadd.f32 1.0, %v1249_v29 }
 0x133   :  { %252 = vrot.lane.b32.xlu0 %v168_v27, %s1413_s27  ;;  %1250 = vrcp.f32 %v247_v30 }
 0x13d   :  { %v1251_v31 = vpop.eup %1250 }
 0x1a1   :  { %v258_v32 = vpop.permute.xlu0 %257 }
 0x1a2   :  { %v260_v33 = vmul.f32 %v1251_v31, %v258_v32 }
 0x1a4   :  { %262 = vrot.lane.b32.xlu1 %v260_v33, %s1413_s27 }
 0x1a5   :  { %v253_v34 = vpop.permute.xlu0 %252 }
 0x1a6   :  { %v255_v35 = vmul.f32 %v1251_v31, %v253_v34 }
 0x216   :  { %v263_v36 = vpop.permute.xlu1 %262 }
 0x217   :  { %v265_v37 = vadd.f32 %v263_v36, %v255_v35  ;;  %v579_v36 = vld [vmem:[#allocation2 + $0x8] sm:$0x3] }
 0x219   :  { %1252 = vtanh.f32 %v265_v37 }
 0x223   :  { %v1253_v38 = vpop.eup %1252 }
 0x224   :  { %268 = vrot.lane.b32.xlu1 %v1253_v38, %s1412_s26 }
 0x296   :  { %v269_v39 = vpop.permute.xlu1 %268 }
 0x297   :  { %v271_v40 = vmul.f32 %v1251_v31, %v269_v39 }
 0x299   :  { %275 = vrot.lane.b32.xlu0 %v271_v40, %s1413_s27 }
 0x30b   :  { %v276_v41 = vpop.permute.xlu0 %275 }
 0x30c   :  { %1110 = vmatmul.mubr.msk.f32.vlgmr.msra.gmra.mrb[2].mxu0 %vm79_vm2, %v276_v41 }
 0x30d   :  { %1206 = vmatpush3.bf16.msra.mxu0 %v1501_v12  ;;  %1131 = vmatprep.mubr.msk.f32.mxu0 %vm1410_vm0, %v1411_v1 }
 0x30e   :  { %1207 = vmatprep.subr.bf16.mxu0 %v1409_v0 }
 0x311   :  { %1209 = vmatpush3.bf16.msra.mxu0 %v1504_v14 }
 0x312   :  { %1216 = vmatprep.subr.bf16.mxu0 %v1409_v0 }
 0x3df   :  { %v345_v43 = vpop.f32.mrb[2].mxu0 }
 0x3e0   :  { %v349_v44 = vadd.f32 %v345_v43, %v273_v42  ;;  %v1111_v45 = vpop.f32.mrb[3].mxu0 }
 0x3e2   :  { %1254 = vtanh.f32 %v349_v44  ;;  %v1020_v47 = vmul.f32 -1.442695, %v349_v44 }
 0x3e4   :  { %1256 = vpow2.f32 %v1020_v47 }
 0x3ec   :  { %v1255_v46 = vpop.eup %1254 }
 0x3ed   :  { %359 = vrot.lane.b32.xlu1 %v1255_v46, %s1412_s26 }
 0x3ee   :  { %v1257_v48 = vpop.eup %1256 }
 0x3ef   :  { %v353_v49 = vadd.f32 1.0, %v1257_v48 }
 0x3f1   :  { %1258 = vrcp.f32 %v353_v49 }
 0x3fb   :  { %v1259_v50 = vpop.eup %1258 }
 0x3fc   :  { %v357_v53 = vmul.f32 %v1259_v50, %v265_v37 }
 0x45f   :  { %v360_v51 = vpop.permute.xlu1 %359 }
 0x460   :  { %v362_v52 = vmul.f32 %v1259_v50, %v360_v51 }
 0x462   :  { %364 = vrot.lane.b32.xlu0 %v362_v52, %s1413_s27 }
 0x4d4   :  { %v365_v54 = vpop.permute.xlu0 %364 }
 0x4d5   :  { %v367_v55 = vadd.f32 %v365_v54, %v357_v53  ;;  %v681_v54 = vld [vmem:[#allocation2 + $0xa] sm:$0x3] }
 0x4d7   :  { %1260 = vtanh.f32 %v367_v55 }
 0x4e1   :  { %v1261_v56 = vpop.eup %1260 }
 0x4e2   :  { %370 = vrot.lane.b32.xlu1 %v1261_v56, %s1412_s26 }
 0x554   :  { %v371_v57 = vpop.permute.xlu1 %370 }
 0x555   :  { %v373_v58 = vmul.f32 %v1259_v50, %v371_v57 }
 0x557   :  { %377 = vrot.lane.b32.xlu0 %v373_v58, %s1413_s27 }
 0x5c9   :  { %v378_v59 = vpop.permute.xlu0 %377 }
 0x5ca   :  { %1121 = vmatmul.mubr.msk.f32.vlgmr.msra.gmra.mrb[2].mxu1 %vm79_vm2, %v378_v59 }
 0x5cb   :  { %1212 = vmatpush3.bf16.msra.mxu1 %v1501_v12  ;;  %1142 = vmatprep.mubr.msk.f32.mxu1 %vm1410_vm0, %v1411_v1 }
 0x5cc   :  { %1213 = vmatprep.subr.bf16.mxu1 %v1409_v0 }
 0x5cf   :  { %1215 = vmatpush3.bf16.msra.mxu1 %v1504_v14 }
 0x5d0   :  { %1222 = vmatprep.subr.bf16.mxu1 %v1409_v0 }
 0x69d   :  { %v447_v61 = vpop.f32.mrb[2].mxu1 }
 0x69e   :  { %v451_v62 = vadd.f32 %v447_v61, %v375_v60  ;;  %v1122_v63 = vpop.f32.mrb[3].mxu1 }
 0x6a0   :  { %1262 = vtanh.f32 %v451_v62  ;;  %v1022_v3 = vmul.f32 -1.442695, %v451_v62 }
 0x6a2   :  { %1264 = vpow2.f32 %v1022_v3 }
 0x6aa   :  { %v1263_v2 = vpop.eup %1262 }
 0x6ab   :  { %461 = vrot.lane.b32.xlu1 %v1263_v2, %s1412_s26 }
 0x6ac   :  { %v1265_v4 = vpop.eup %1264 }
 0x6ad   :  { %v455_v5 = vadd.f32 1.0, %v1265_v4 }
 0x6af   :  { %1266 = vrcp.f32 %v455_v5 }
 0x6b9   :  { %v1267_v6 = vpop.eup %1266 }
 0x6ba   :  { %v459_v9 = vmul.f32 %v1267_v6, %v367_v55 }
 0x71d   :  { %v462_v7 = vpop.permute.xlu1 %461 }
 0x71e   :  { %v464_v8 = vmul.f32 %v1267_v6, %v462_v7 }
 0x720   :  { %466 = vrot.lane.b32.xlu0 %v464_v8, %s1413_s27 }
 0x792   :  { %v467_v10 = vpop.permute.xlu0 %466 }
 0x793   :  { %v469_v11 = vadd.f32 %v467_v10, %v459_v9 }
 0x795   :  { %1268 = vtanh.f32 %v469_v11 }
 0x79f   :  { %v1269_v13 = vpop.eup %1268 }
 0x7a0   :  { %472 = vrot.lane.b32.xlu1 %v1269_v13, %s1412_s26 }
 0x812   :  { %v473_v15 = vpop.permute.xlu1 %472 }
 0x813   :  { %v475_v16 = vmul.f32 %v1267_v6, %v473_v15  ;;  %v783_v6 = vld [vmem:[#allocation2 + $0xc] sm:$0x3] }
 0x815   :  { %479 = vrot.lane.b32.xlu0 %v475_v16, %s1413_s27 }
 0x887   :  { %v480_v17 = vpop.permute.xlu0 %479 }
 0x888   :  { %1132 = vmatmul.mubr.msk.f32.vlgmr.msra.gmra.mrb[4].mxu0 %vm79_vm2, %v480_v17 }
 0x889   :  { %1218 = vmatpush3.bf16.msra.mxu0 %v1501_v12  ;;  %1153 = vmatprep.mubr.msk.f32.mxu0 %vm1410_vm0, %v1411_v1 }
 0x88a   :  { %1219 = vmatprep.subr.bf16.mxu0 %v1409_v0 }
 0x88d   :  { %1221 = vmatpush3.bf16.msra.mxu0 %v1504_v14 }
 0x88e   :  { %1228 = vmatprep.subr.bf16.mxu0 %v1409_v0 }
 0x95b   :  { %v549_v19 = vpop.f32.mrb[4].mxu0 }
 0x95c   :  { %v553_v20 = vadd.f32 %v549_v19, %v477_v18  ;;  %v1133_v21 = vpop.f32.mrb[5].mxu0 }
 0x95e   :  { %1270 = vtanh.f32 %v553_v20  ;;  %v1024_v23 = vmul.f32 -1.442695, %v553_v20 }
 0x960   :  { %1272 = vpow2.f32 %v1024_v23 }
 0x968   :  { %v1271_v22 = vpop.eup %1270 }
 0x969   :  { %563 = vrot.lane.b32.xlu1 %v1271_v22, %s1412_s26 }
 0x96a   :  { %v1273_v24 = vpop.eup %1272 }
 0x96b   :  { %v557_v25 = vadd.f32 1.0, %v1273_v24 }
 0x96d   :  { %1274 = vrcp.f32 %v557_v25 }
 0x977   :  { %v1275_v26 = vpop.eup %1274 }
 0x978   :  { %v561_v29 = vmul.f32 %v1275_v26, %v469_v11 }
 0x9db   :  { %v564_v27 = vpop.permute.xlu1 %563 }
 0x9dc   :  { %v566_v28 = vmul.f32 %v1275_v26, %v564_v27 }
 0x9de   :  { %568 = vrot.lane.b32.xlu0 %v566_v28, %s1413_s27 }
 0xa50   :  { %v569_v30 = vpop.permute.xlu0 %568 }
 0xa51   :  { %v571_v31 = vadd.f32 %v569_v30, %v561_v29 }
 0xa53   :  { %1276 = vtanh.f32 %v571_v31 }
 0xa5d   :  { %v1277_v32 = vpop.eup %1276 }
 0xa5e   :  { %574 = vrot.lane.b32.xlu1 %v1277_v32, %s1412_s26 }
 0xad0   :  { %v575_v33 = vpop.permute.xlu1 %574 }
 0xad1   :  { %v577_v34 = vmul.f32 %v1275_v26, %v575_v33  ;;  %v885_v26 = vld [vmem:[#allocation2 + $0xe] sm:$0x3] }
 0xad3   :  { %581 = vrot.lane.b32.xlu0 %v577_v34, %s1413_s27 }
 0xb45   :  { %v582_v35 = vpop.permute.xlu0 %581 }
 0xb46   :  { %1143 = vmatmul.mubr.msk.f32.vlgmr.msra.gmra.mrb[4].mxu1 %vm79_vm2, %v582_v35 }
 0xb47   :  { %1224 = vmatpush3.bf16.msra.mxu1 %v1501_v12  ;;  %1164 = vmatprep.mubr.msk.f32.mxu1 %vm1410_vm0, %v1411_v1 }
 0xb48   :  { %1225 = vmatprep.subr.bf16.mxu1 %v1409_v0 }
 0xb4b   :  { %1227 = vmatpush3.bf16.msra.mxu1 %v1504_v14 }
 0xc19   :  { %v651_v37 = vpop.f32.mrb[4].mxu1 }
 0xc1a   :  { %v655_v38 = vadd.f32 %v651_v37, %v579_v36  ;;  %v1144_v39 = vpop.f32.mrb[5].mxu1 }
 0xc1c   :  { %1278 = vtanh.f32 %v655_v38  ;;  %v1026_v41 = vmul.f32 -1.442695, %v655_v38 }
 0xc1e   :  { %1280 = vpow2.f32 %v1026_v41 }
 0xc26   :  { %v1279_v40 = vpop.eup %1278 }
 0xc27   :  { %665 = vrot.lane.b32.xlu1 %v1279_v40, %s1412_s26 }
 0xc28   :  { %v1281_v42 = vpop.eup %1280 }
 0xc29   :  { %v659_v43 = vadd.f32 1.0, %v1281_v42 }
 0xc2b   :  { %1282 = vrcp.f32 %v659_v43 }
 0xc35   :  { %v1283_v44 = vpop.eup %1282 }
 0xc36   :  { %v663_v47 = vmul.f32 %v1283_v44, %v571_v31 }
 0xc99   :  { %v666_v45 = vpop.permute.xlu1 %665 }
 0xc9a   :  { %v668_v46 = vmul.f32 %v1283_v44, %v666_v45 }
 0xc9c   :  { %670 = vrot.lane.b32.xlu0 %v668_v46, %s1413_s27 }
 0xd0e   :  { %v671_v48 = vpop.permute.xlu0 %670 }
 0xd0f   :  { %v673_v49 = vadd.f32 %v671_v48, %v663_v47 }
 0xd11   :  { %1284 = vtanh.f32 %v673_v49 }
 0xd1b   :  { %v1285_v50 = vpop.eup %1284 }
 0xd1c   :  { %676 = vrot.lane.b32.xlu1 %v1285_v50, %s1412_s26 }
 0xd8e   :  { %v677_v51 = vpop.permute.xlu1 %676 }
 0xd8f   :  { %v679_v52 = vmul.f32 %v1283_v44, %v677_v51 }
 0xd91   :  { %683 = vrot.lane.b32.xlu0 %v679_v52, %s1413_s27 }
 0xe03   :  { %v684_v53 = vpop.permute.xlu0 %683 }
 0xe04   :  { %1154 = vmatmul.mubr.msk.f32.vlgmr.msra.gmra.mrb[6].mxu0 %vm79_vm2, %v684_v53 }
 0xe05   :  { %1230 = vmatpush3.bf16.msra.mxu0 %v1501_v12  ;;  %1175 = vmatprep.mubr.msk.f32.mxu0 %vm1410_vm0, %v1411_v1 }
 0xe06   :  { %1231 = vmatprep.subr.bf16.mxu0 %v1409_v0 }
 0xe09   :  { %1233 = vmatpush3.bf16.msra.mxu0 %v1504_v14 }
 0xed7   :  { %v753_v55 = vpop.f32.mrb[6].mxu0 }
 0xed8   :  { %v757_v56 = vadd.f32 %v753_v55, %v681_v54  ;;  %v1155_v57 = vpop.f32.mrb[7].mxu0 }
 0xeda   :  { %1286 = vtanh.f32 %v757_v56  ;;  %v1028_v59 = vmul.f32 -1.442695, %v757_v56 }
 0xedc   :  { %1288 = vpow2.f32 %v1028_v59 }
 0xee4   :  { %v1287_v58 = vpop.eup %1286 }
 0xee5   :  { %767 = vrot.lane.b32.xlu1 %v1287_v58, %s1412_s26 }
 0xee6   :  { %v1289_v60 = vpop.eup %1288 }
 0xee7   :  { %v761_v61 = vadd.f32 1.0, %v1289_v60 }
 0xee9   :  { %1290 = vrcp.f32 %v761_v61 }
 0xef3   :  { %v1291_v12 = vpop.eup %1290 }
 0xef4   :  { %v765_v0 = vmul.f32 %v1291_v12, %v673_v49 }
 0xf57   :  { %v768_v62 = vpop.permute.xlu1 %767 }
 0xf58   :  { %v770_v1 = vmul.f32 %v1291_v12, %v768_v62 }
 0xf5a   :  { %772 = vrot.lane.b32.xlu0 %v770_v1, %s1413_s27 }
 0xfcc   :  { %v773_v14 = vpop.permute.xlu0 %772 }
 0xfcd   :  { %v775_v63 = vadd.f32 %v773_v14, %v765_v0 }
 0xfcf   :  { %1292 = vtanh.f32 %v775_v63 }
 0xfd9   :  { %v1293_v2 = vpop.eup %1292 }
 0xfda   :  { %778 = vrot.lane.b32.xlu1 %v1293_v2, %s1412_s26 }
0x104c   :  { %v779_v3 = vpop.permute.xlu1 %778 }
0x104d   :  { %v781_v4 = vmul.f32 %v1291_v12, %v779_v3 }
0x104f   :  { %785 = vrot.lane.b32.xlu0 %v781_v4, %s1413_s27 }
0x10c1   :  { %v786_v5 = vpop.permute.xlu0 %785 }
0x10c2   :  { %1165 = vmatmul.mubr.msk.f32.vlgmr.msra.gmra.mrb[6].mxu1 %vm79_vm2, %v786_v5 }
0x1195   :  { %v855_v7 = vpop.f32.mrb[6].mxu1 }
0x1196   :  { %v859_v8 = vadd.f32 %v855_v7, %v783_v6  ;;  %v1166_v9 = vpop.f32.mrb[7].mxu1 }
0x1198   :  { %1294 = vtanh.f32 %v859_v8  ;;  %v1030_v11 = vmul.f32 -1.442695, %v859_v8 }
0x119a   :  { %1296 = vpow2.f32 %v1030_v11 }
0x11a2   :  { %v1295_v10 = vpop.eup %1294 }
0x11a3   :  { %869 = vrot.lane.b32.xlu1 %v1295_v10, %s1412_s26 }
0x11a4   :  { %v1297_v13 = vpop.eup %1296 }
0x11a5   :  { %v863_v15 = vadd.f32 1.0, %v1297_v13 }
0x11a7   :  { %1298 = vrcp.f32 %v863_v15 }
0x11b1   :  { %v1299_v16 = vpop.eup %1298 }
0x11b2   :  { %v867_v19 = vmul.f32 %v1299_v16, %v775_v63 }
0x1215   :  { %v870_v17 = vpop.permute.xlu1 %869 }
0x1216   :  { %v872_v18 = vmul.f32 %v1299_v16, %v870_v17 }
0x1218   :  { %874 = vrot.lane.b32.xlu0 %v872_v18, %s1413_s27 }
0x128a   :  { %v875_v20 = vpop.permute.xlu0 %874 }
0x128b   :  { %v877_v21 = vadd.f32 %v875_v20, %v867_v19 }
0x128d   :  { %1300 = vtanh.f32 %v877_v21 }
0x1297   :  { %v1301_v22 = vpop.eup %1300 }
0x1298   :  { %880 = vrot.lane.b32.xlu1 %v1301_v22, %s1412_s26 }
0x130a   :  { %v881_v23 = vpop.permute.xlu1 %880 }
0x130b   :  { %v883_v24 = vmul.f32 %v1299_v16, %v881_v23 }
0x130d   :  { %887 = vrot.lane.b32.xlu0 %v883_v24, %s1413_s27 }
0x137f   :  { %v888_v25 = vpop.permute.xlu0 %887 }
0x1380   :  { %1176 = vmatmul.mubr.msk.f32.vlgmr.msra.gmra.mrb[8].mxu0 %vm79_vm2, %v888_v25 }
0x1453   :  { %v957_v27 = vpop.f32.mrb[8].mxu0 }
0x1454   :  { %v961_v28 = vadd.f32 %v957_v27, %v885_v26  ;;  %v1177_v29 = vpop.f32.mrb[9].mxu0 }
0x1456   :  { %1302 = vtanh.f32 %v961_v28  ;;  %v1032_v31 = vmul.f32 -1.442695, %v961_v28 }
0x1458   :  { %1304 = vpow2.f32 %v1032_v31 }
0x1460   :  { %v1303_v30 = vpop.eup %1302 }
0x1461   :  { %971 = vrot.lane.b32.xlu1 %v1303_v30, %s1412_s26 }
0x1462   :  { %v1305_v32 = vpop.eup %1304 }
0x1463   :  { %v965_v33 = vadd.f32 1.0, %v1305_v32 }
0x1465   :  { %1306 = vrcp.f32 %v965_v33 }
0x146f   :  { %v1307_v34 = vpop.eup %1306 }
0x1470   :  { %v969_v37 = vmul.f32 %v1307_v34, %v877_v21 }
0x14d3   :  { %v972_v35 = vpop.permute.xlu1 %971 }
0x14d4   :  { %v974_v36 = vmul.f32 %v1307_v34, %v972_v35 }
0x14d6   :  { %976 = vrot.lane.b32.xlu0 %v974_v36, %s1413_s27 }
0x1548   :  { %v977_v38 = vpop.permute.xlu0 %976 }
0x1549   :  { %v979_v39 = vadd.f32 %v977_v38, %v969_v37 }
0x154b   :  { %1308 = vtanh.f32 %v979_v39 }
0x1555   :  { %v1309_v40 = vpop.eup %1308 }
0x1556   :  { %982 = vrot.lane.b32.xlu1 %v1309_v40, %s1412_s26 }
0x155a   :  { %993 = vrot.lane.b32.xlu1 %v979_v39, %s1414_s3 }
0x15c8   :  { %v983_v41 = vpop.permute.xlu1 %982 }
0x15c9   :  { %v985_v42 = vmul.f32 %v1307_v34, %v983_v41 }
0x15cb   :  { %987 = vrot.lane.b32.xlu0 %v985_v42, %s1413_s27 }
0x15cc   :  { %v994_v43 = vpop.permute.xlu1 %993 }
0x15cd   :  { %996 = vst.msk [vmem:[#allocation4] sm:$0x3] %vm63_vm1, %v994_v43 }
0x163d   :  { %v988_v44 = vpop.permute.xlu0 %987 }
0x163e   :  { %991 = vst.msk [vmem:[#allocation3] sm:$0x3] %vm63_vm1, %v988_v44  ;;  %997 = vst.msk [vmem:[#allocation11] sm:$0x3] %vm63_vm1, %v988_v44 }
0x163f   :  { %1387 = shalt.err (!%p1384_p0)
}
0x1640   :  { %s1388_s7 = scalar_lea.hbm %s1614_s4, 32 }
0x1641   :  { %p1389_p1 = scmp.ne.s32.totalorder %s1614_s4, %s1388_s7  ;;  %p1392_p2 = scmp.lt.u32.totalorder %s1388_s7, %s1614_s4 }
0x1643   :  { %p1394_p3 = pnand %p1392_p2, %p1389_p1 }
0x1645   :  { %1397 = shalt.err (!%p1394_p3)
}
0x1646   :  { %1007 = dma.vmem_to_hbm [thread:$0]  %s1005_s29, 32, %s1614_s4, [#allocation7]  }
0x1647   :  { %1402 = dma.done.wait [#allocation7], 32  }
0x1648   :  { %1403 = vsyncadd [#allocation7], 4294967264 }
0x1649   :  { %1011 = vsyncpa [#allocation6], 1 }
0x164a   :  { %1012 = vsyncpa [#allocation9], 1 }
0x164b   :  { %1013 = vsyncpa [#allocation7], 1 }

</bundles_post_ra>
